<compile_context>
chip_gen: v7x
topology: tpu7x:2x2x1
jax: 0.10.0
libtpu: 0.0.40
codegen_flags: <defaults>
</compile_context>

<pallas_src>
import functools

import jax
import jax.numpy as jnp
from jax.experimental import pallas as pl
from jax.experimental.pallas import tpu as pltpu


def _round_up(x: int, m: int) -> int:
    return ((x + m - 1) // m) * m


def _vmem_budget_bytes() -> int:
    # Generation-aware budget with headroom: 3/4 of physical VMEM
    # (v7x: 64 MiB -> 48 MiB budget; v5e/v6e: 128 MiB -> 96 MiB budget).
    try:
        cap = pltpu.get_tpu_info().vmem_capacity_bytes
    except Exception:
        cap = 64 * 1024 * 1024          # safe floor (v7x)
    return int(cap) * 3 // 4


def pick_tiles(B: int, V: int, D: int, w_bytes: int = 2, out_bytes: int = 4):
    """Pick (tile_b, B_pad, tile_v, V_pad): largest lane-dense V tile that fits
    the double-buffered VMEM footprint, keeping >=2 V tiles when possible."""
    B_pad = _round_up(B, 8)
    tile_b = min(256, B_pad)
    B_pad = _round_up(B_pad, tile_b)

    budget = _vmem_budget_bytes()
    # footprint ~= 2*weight tiles + 2*bias tiles + 2*output tiles + resident act
    denom = 2 * D * w_bytes + 2 * tile_b * out_bytes + 2 * out_bytes
    avail = budget - 2 * tile_b * D * w_bytes
    tile_v = max(128, (avail // denom) // 128 * 128)
    tile_v = min(tile_v, 8192)                     # diminishing returns past this
    V_pad = _round_up(V, 128)
    tile_v = min(tile_v, V_pad)
    # Keep the "parallel" V axis splittable across v7x's two TensorCores.
    if V_pad // tile_v < 2 and V_pad >= 256:
        tile_v = max(128, (V_pad // 2) // 128 * 128)
    V_pad = _round_up(V, tile_v)
    return tile_b, B_pad, tile_v, V_pad


def prepare_cbow_params(lin_w, lin_b, V_pad: int):
    """One-time layout plumbing (hoisted out of the per-call forward):
    transpose lin_w -> (D, V_pad), cast to bf16; pad bias -> (1, V_pad) f32."""
    V, _ = lin_w.shape
    w_p = jnp.pad(lin_w.T, ((0, 0), (0, V_pad - V))).astype(jnp.bfloat16)
    b_p = jnp.pad(lin_b.reshape(1, V), ((0, 0), (0, V_pad - V))).astype(jnp.float32)
    return w_p, b_p


def cbow_kernel(x_ref, w_ref, b_ref, out_ref):
    # x_ref:   (tile_b, D)       bf16 mean context embedding tile
    # w_ref:   (D, tile_v)       bf16 pre-transposed weight tile (streamed)
    # b_ref:   (1, tile_v)       f32 bias tile
    # out_ref: (tile_b, tile_v)  f32 logsigmoid(logits) tile
    logits = jnp.dot(x_ref[...], w_ref[...],
                     preferred_element_type=jnp.float32)   # MXU, f32 accumulate
    logits = logits + b_ref[...]                           # broadcast bias (VPU)
    out_ref[...] = jax.nn.log_sigmoid(logits)              # elementwise (EUP/VPU)


@functools.partial(jax.jit, static_argnames=("V", "tile_v", "tile_b", "B_pad"))
def cbow_forward(indices, emb_table, w_p, b_p, *, V, tile_v, tile_b, B_pad):
    """indices: (B, C) int32; emb_table: (V, D) f32;
    w_p: (D, V_pad) bf16 pre-transposed weight; b_p: (1, V_pad) f32 bias."""
    B, _ = indices.shape
    D = emb_table.shape[1]
    V_pad = w_p.shape[1]

    assert tile_v % 128 == 0, "tile_v must be a multiple of 128 (lane-dense stores)"
    assert B_pad % tile_b == 0 and V_pad % tile_v == 0

    # ---- plain-JAX glue: gather + context mean (data-dependent indexing) ----
    mean = jnp.mean(jnp.take(emb_table, indices, axis=0), axis=1)    # (B, D) f32
    mean_p = jnp.pad(mean, ((0, B_pad - B), (0, 0))).astype(jnp.bfloat16)

    grid = (B_pad // tile_b, V_pad // tile_v)

    out = pl.pallas_call(
        cbow_kernel,
        out_shape=jax.ShapeDtypeStruct((B_pad, V_pad), jnp.float32),
        grid=grid,
        in_specs=[
            pl.BlockSpec((tile_b, D), lambda i, j: (i, 0)),    # activation tile
            pl.BlockSpec((D, tile_v), lambda i, j: (0, j)),    # bf16 weight stream
            pl.BlockSpec((1, tile_v), lambda i, j: (0, j)),    # bias tile
        ],
        out_specs=pl.BlockSpec((tile_b, tile_v), lambda i, j: (i, j)),
        compiler_params=pltpu.CompilerParams(
            dimension_semantics=("parallel", "parallel"),       # shard across TCs
            vmem_limit_bytes=_vmem_budget_bytes(),
        ),
    )(mean_p, w_p, b_p)

    return out[:B, :V]


if __name__ == "__main__":
    # Small shapes consistent with CBOW(vocab_size, embedding_dim)
    VOCAB = 128      # vocab_size
    EMB_DIM = 16     # embedding_dim
    BATCH = 8
    CONTEXT = 4      # context window length (dim reduced by mean)

    key = jax.random.PRNGKey(0)
    k_emb, k_w, k_b, k_idx = jax.random.split(key, 4)

    # Deterministic param init (nn.Embedding ~ N(0,1); nn.Linear ~ U(-1/sqrt(D), 1/sqrt(D)))
    emb_table = jax.random.normal(k_emb, (VOCAB, EMB_DIM), dtype=jnp.float32)
    bound = 1.0 / (EMB_DIM ** 0.5)
    lin_w = jax.random.uniform(k_w, (VOCAB, EMB_DIM), minval=-bound, maxval=bound,
                               dtype=jnp.float32)
    lin_b = jax.random.uniform(k_b, (VOCAB,), minval=-bound, maxval=bound,
                               dtype=jnp.float32)

    # Example input: context word indices
    indices = jax.random.randint(k_idx, (BATCH, CONTEXT), 0, VOCAB, dtype=jnp.int32)

    # One-time tile selection + parameter layout prep (hoisted out of forward)
    tile_b, B_pad, tile_v, V_pad = pick_tiles(BATCH, VOCAB, EMB_DIM)
    w_p, b_p = prepare_cbow_params(lin_w, lin_b, V_pad)

    out = cbow_forward(indices, emb_table, w_p, b_p,
                       V=VOCAB, tile_v=tile_v, tile_b=tile_b, B_pad=B_pad)
    out = jax.block_until_ready(out)

    # Pure-JAX f32 reference; tolerance relaxed for bf16 weight/activation streaming
    ref = jax.nn.log_sigmoid(
        jnp.mean(jnp.take(emb_table, indices, axis=0), axis=1) @ lin_w.T + lin_b)
    assert out.shape == (BATCH, VOCAB)
    assert jnp.allclose(out, ref, atol=2e-2, rtol=2e-2)

    print("KERNEL_OK")
</pallas_src>

<mosaic_0001>
module attributes {stable_mosaic.version = 11 : i64} {
  func.func @cbow_kernel(%arg0: i32, %arg1: i32, %arg2: memref<8x16xbf16, #tpu.memory_space<vmem>>, %arg3: memref<16x128xbf16, #tpu.memory_space<vmem>>, %arg4: memref<1x128xf32, #tpu.memory_space<vmem>>, %arg5: memref<8x128xf32, #tpu.memory_space<vmem>>) attributes {dimension_semantics = [#tpu.dimension_semantics<parallel>, #tpu.dimension_semantics<parallel>], iteration_bounds = array<i64: 1, 1>, scalar_prefetch = 0 : i64, scratch_operands = 0 : i64, tpu.core_type = #tpu.core_type<tc>, window_params = [{transform_indices = @transform_0, window_bounds = array<i64: 8, 16>}, {transform_indices = @transform_1, window_bounds = array<i64: 16, 128>}, {transform_indices = @transform_2, window_bounds = array<i64: 1, 128>}, {transform_indices = @transform_3, window_bounds = array<i64: 8, 128>}]} {
    %c0 = arith.constant 0 : index
    %c0_0 = arith.constant 0 : index
    %0 = vector.load %arg2[%c0, %c0_0] : memref<8x16xbf16, #tpu.memory_space<vmem>>, vector<8x16xbf16>
    %c0_1 = arith.constant 0 : index
    %c0_2 = arith.constant 0 : index
    %1 = vector.load %arg3[%c0_1, %c0_2] : memref<16x128xbf16, #tpu.memory_space<vmem>>, vector<16x128xbf16>
    %cst = arith.constant dense<0.000000e+00> : vector<8x128xf32>
    %2 = tpu.matmul %0, %1, %cst {dimension_numbers = #tpu.dot_dimension_numbers<[1], [0], [0], [1], [0, 0, 1, 1], [], []>} : vector<8x16xbf16>, vector<16x128xbf16>, vector<8x128xf32> -> vector<8x128xf32>
    %c0_3 = arith.constant 0 : index
    %c0_4 = arith.constant 0 : index
    %3 = vector.load %arg4[%c0_3, %c0_4] : memref<1x128xf32, #tpu.memory_space<vmem>>, vector<1x128xf32>
    %4 = vector.broadcast %3 : vector<1x128xf32> to vector<8x128xf32>
    %5 = arith.addf %2, %4 : vector<8x128xf32>
    %cst_5 = arith.constant 0.000000e+00 : f32
    %6 = vector.broadcast %cst_5 : f32 to vector<8x128xf32>
    %7 = arith.subf %6, %5 : vector<8x128xf32>
    %cst_6 = arith.constant 0.000000e+00 : f32
    %8 = vector.broadcast %cst_6 : f32 to vector<8x128xf32>
    %9 = arith.maximumf %7, %8 : vector<8x128xf32>
    %10 = vector.broadcast %cst_6 : f32 to vector<8x128xf32>
    %11 = arith.subf %7, %10 : vector<8x128xf32>
    %12 = arith.cmpf one, %11, %11 : vector<8x128xf32>
    %13 = vector.broadcast %cst_6 : f32 to vector<8x128xf32>
    %14 = arith.addf %7, %13 : vector<8x128xf32>
    %15 = math.absf %11 : vector<8x128xf32>
    %cst_7 = arith.constant 0.000000e+00 : f32
    %16 = vector.broadcast %cst_7 : f32 to vector<8x128xf32>
    %17 = arith.subf %16, %15 : vector<8x128xf32>
    %18 = math.exp %17 : vector<8x128xf32>
    %19 = math.log1p %18 : vector<8x128xf32>
    %20 = arith.addf %9, %19 : vector<8x128xf32>
    %21 = arith.select %12, %14, %20 : vector<8x128xi1>, vector<8x128xf32>
    %cst_8 = arith.constant 0.000000e+00 : f32
    %22 = vector.broadcast %cst_8 : f32 to vector<8x128xf32>
    %23 = arith.subf %22, %21 : vector<8x128xf32>
    %c0_9 = arith.constant 0 : index
    %c0_10 = arith.constant 0 : index
    %24 = vector.load %arg5[%c0_9, %c0_10] : memref<8x128xf32, #tpu.memory_space<vmem>>, vector<8x128xf32>
    tpu.vector_store %arg5[%c0_9, %c0_10], %23 {strides = array<i32>} : memref<8x128xf32, #tpu.memory_space<vmem>>, vector<8x128xf32>,
    return
  }
  func.func @transform_0(%arg0: i32, %arg1: i32) -> (i32, i32) {
    %c0_i32 = arith.constant 0 : i32
    %c0_i32_0 = arith.constant 0 : i32
    return %arg0, %c0_i32 : i32, i32
  }
  func.func @transform_1(%arg0: i32, %arg1: i32) -> (i32, i32) {
    %c0_i32 = arith.constant 0 : i32
    %c0_i32_0 = arith.constant 0 : i32
    return %c0_i32, %arg1 : i32, i32
  }
  func.func @transform_2(%arg0: i32, %arg1: i32) -> (i32, i32) {
    %c0_i32 = arith.constant 0 : i32
    %c0_i32_0 = arith.constant 0 : i32
    return %c0_i32, %arg1 : i32, i32
  }
  func.func @transform_3(%arg0: i32, %arg1: i32) -> (i32, i32) {
    %c0_i32 = arith.constant 0 : i32
    return %arg0, %arg1 : i32, i32
  }
}

</mosaic_0001>

<bundles_post_ra>
// kernel: cbow_forward.1
= control target key start
LH: loop header
LB: loop body
LE: loop exit
PB: predicated region body
PF: predicated region fallthrough
CT: control target
= control target key end

     0   :  { %v154_v1 = vmov 0.0   ;;  %vm155_vm0 = vmmov 0   ;;  %vm32_vm1 = vcmask 130048   ;;  %s198_s0 = inlined_call_operand.vmem [shape: bf16[8,16], index: 0, kind: input, shape index: {}]   ;;  %s199_s1 = inlined_call_operand.vmem [shape: bf16[16,128], index: 1, kind: input, shape index: {}]   ;;  %s200_s2 = inlined_call_operand.vmem [shape: f32[1,128], index: 2, kind: input, shape index: {}]   ;;  %s201_s3 = inlined_call_operand.hbm [shape: f32[8,128], index: 3, kind: output, shape index: {}]  }
   0x1   :  { %v125_v0 = vld [vmem:[%s199_s1] sm:$0xff]   ;;  %116 = vmatprep.subr.bf16.mxu0 %v154_v1  ;;  %118 = vmatprep.mubr.msk.bf16.mxu0 %vm155_vm0, %v154_v1 }
   0x2   :  { %117 = vmatpush3.bf16.msra.mxu0 %v125_v0  ;;  %v16_v2 = vld [vmem:[%s198_s0] sm:$0xf] }
   0x3   :  { %8 = vsyncpa [#allocation3], 0  ;;  %v111_v3 = vld [vmem:[%s200_s2] ss:$0 sm:$0xff]  ;;  %s156_s0 = smov [#allocation2]  }
   0x4   :  { %s103_s1 = sshll.u32 %s156_s0, 4  ;;  %s104_s1 = int_to_ptr.vmem [resolvable:$true] %s103_s1 }
   0x5   :  { %119 = vmatmul.mubr.msk.bf16.vlgmr.msra.gmra.mrb[0].mxu0 %vm32_vm1, %v16_v2  ;;  %s130_s2 = scalar_lea.vmem %s104_s1, 128  ;;  %p135_p1 = scmp.lt.s32.totalorder %s104_s1, %s104_s1 }
   0x6   :  { %p131_p0 = scmp.ne.s32.totalorder %s104_s1, %s130_s2  ;;  %p136_p2 = scmp.lt.s32.totalorder %s130_s2, %s130_s2 }
   0x8   :  { %p137_p3 = por %p136_p2, %p135_p1 }
   0xa   :  { %p138_p4 = pnand %p137_p3, %p131_p0 }
  0xd8   :  { %v70_v4 = vpop.f32.mrb[0].mxu0 }
  0xd9   :  { %v71_v5 = vadd.f32 %v111_v3, %v70_v4  ;;  %v120_v6 = vpop.f32.mrb[1].mxu0 }
  0xda   :  { %v73_v7 = vpop.f32.mrb[2].mxu0 }
  0xdb   :  { %v76_v8 = vsub.f32 0.0, %v71_v5  ;;  %v121_v9 = vpop.f32.mrb[3].mxu0 }
  0xdd   :  { %v80_v10 = vand.u32 2147483647, %v76_v8  ;;  %v77_v21 = vmax.f32 %v76_v8, 0.0  ;;  %vm78_vm3 = vcmp.ne.f32.partialorder %v76_v8, %v76_v8 }
  0xdf   :  { %v81_v11 = vsub.f32 0.0, %v80_v10 }
  0xe1   :  { %v82_v12 = vmul.f32 1.442695, %v81_v11 }
  0xe3   :  { %126 = vpow2.f32 %v82_v12 }
  0xed   :  { %v127_v13 = vpop.eup %126 }
  0xee   :  { %v84_v14 = vadd.f32 1.0, %v127_v13  ;;  %v87_v15 = vmul.f32 -0.5, %v127_v13  ;;  %v90_v17 = vand.u32 2147483647, %v127_v13 }
  0xf0   :  { %128 = vlog2.f32 %v84_v14  ;;  %v88_v16 = vadd.f32 1.0, %v87_v15  ;;  %vm91_vm2 = vcmp.lt.f32.partialorder %v90_v17, 0.0004427343 }
  0xf2   :  { %v89_v20 = vmul.f32 %v127_v13, %v88_v16 }
  0xfa   :  { %v129_v18 = vpop.eup %128 }
  0xfb   :  { %v86_v19 = vmul.f32 0.6931472, %v129_v18 }
  0xfd   :  { %v92_v22 = vsel %vm91_vm2, %v89_v20, %v86_v19 }
  0xfe   :  { %v93_v23 = vadd.f32 %v92_v22, %v77_v21 }
 0x100   :  { %v94_v24 = vsel %vm78_vm3, %v76_v8, %v93_v23 }
 0x101   :  { %v95_v25 = vsub.f32 0.0, %v94_v24 }
 0x103   :  { %96 = vst [vmem:[#allocation2] sm:$0xff] %v95_v25 }
 0x104   :  { %141 = shalt.err (!%p138_p4)
}
 0x105   :  { %s142_s20 = scalar_lea.hbm %s201_s3, 128 }
 0x106   :  { %p143_p5 = scmp.ne.s32.totalorder %s201_s3, %s142_s20  ;;  %p146_p6 = scmp.lt.u32.totalorder %s142_s20, %s201_s3 }
 0x108   :  { %p148_p7 = pnand %p146_p6, %p143_p5 }
 0x10a   :  { %151 = shalt.err (!%p148_p7)
}
 0x10b   :  { %106 = dma.vmem_to_hbm [thread:$0]  %s104_s1, 128, %s201_s3, [#allocation3]  }
 0x10c   :  { %152 = dma.done.wait [#allocation3], 128  }
 0x10d   :  { %153 = vsyncadd [#allocation3], 4294967168 }
 0x10e   :  { %110 = vsyncpa [#allocation3], 1 }

</bundles_post_ra>
